<compile_context>
chip_gen: v5e
topology: v5e:2x2
jax: 0.10.0
libtpu: 0.0.40
codegen_flags: <defaults>
</compile_context>

<pallas_src>
import jax
import jax.numpy as jnp
from jax.experimental import pallas as pl
from jax.experimental.pallas import tpu as pltpu

_LANE = 128
_SUB = 8


def _round_up(x, m):
    return (x + m - 1) // m * m


def _vmem_capacity_bytes():
    # Trace/Python-time hardware query; fall back to the smallest per-core
    # VMEM across v5e/v6e/v7x (v7x: 64 MiB per TensorCore).
    try:
        return int(pltpu.get_tpu_info().vmem_capacity_bytes)
    except Exception:
        return 64 << 20


def _sigmoid(x):
    # Exact identity: sigmoid(x) = 0.5 * tanh(0.5 * x) + 0.5  (1 EUP op).
    return 0.5 * jnp.tanh(0.5 * x) + 0.5


def _lstm_cell_kernel(x_ref, h_ref, cx_ref, wx_ref, wh_ref, b_ref,
                      hy_ref, cy_ref):
    """One (gate-H tile, batch tile) block of the LSTM cell.

    x_ref : (TB, I)       input slice (native dtype)
    h_ref : (TB, H)       hidden-state slice (native dtype)
    cx_ref: (TB, TN)      cell-state slice (native dtype)
    wx_ref: (I, 4*TN)     gate-blocked x2h weight columns [Wi|Wf|Wg|Wo]
    wh_ref: (H, 4*TN)     gate-blocked h2h weight columns [Wi|Wf|Wg|Wo]
    b_ref : (1, 4*TN)     fused bias (f32), same gate-blocked layout
    hy_ref, cy_ref: (TB, TN) outputs
    """
    wdt = wx_ref.dtype
    # One wide MXU matmul per operand (N = 4*TN), f32 accumulation.
    acc = jnp.dot(x_ref[...].astype(wdt), wx_ref[...],
                  preferred_element_type=jnp.float32)
    acc = acc + jnp.dot(h_ref[...].astype(wdt), wh_ref[...],
                        preferred_element_type=jnp.float32)
    acc = acc + b_ref[...].astype(jnp.float32)        # (TB, 4*TN)

    tn = acc.shape[-1] // 4                            # static, 128-multiple
    ingate     = _sigmoid(acc[:, 0 * tn:1 * tn])
    forgetgate = _sigmoid(acc[:, 1 * tn:2 * tn])
    cellgate   = jnp.tanh(acc[:, 2 * tn:3 * tn])
    outgate    = _sigmoid(acc[:, 3 * tn:4 * tn])

    cx = cx_ref[...].astype(jnp.float32)
    cy = forgetgate * cx + ingate * cellgate
    hy = outgate * jnp.tanh(cy)

    cy_ref[...] = cy.astype(cy_ref.dtype)
    hy_ref[...] = hy.astype(hy_ref.dtype)


def _gate_blocked_weight(w, H, Hp, TN, dtype):
    """(4H, Kin) PyTorch-Linear weight -> (Kin, 4*Hp) gate-blocked columns.

    For gate-H tile j, columns [j*4*TN : (j+1)*4*TN] hold [Wi|Wf|Wg|Wo] for
    hidden slice [j*TN : (j+1)*TN] (zero-padded H..Hp).
    """
    Kin = w.shape[1]
    nn = Hp // TN
    wt = w.T.reshape(Kin, 4, H).astype(dtype)                    # (Kin, 4, H)
    wp = jnp.zeros((Kin, 4, Hp), dtype).at[:, :, :H].set(wt)     # pad hidden
    wp = wp.reshape(Kin, 4, nn, TN).transpose(0, 2, 1, 3)        # (Kin,nn,4,TN)
    return wp.reshape(Kin, nn * 4 * TN)


def _choose_tn(Hp, input_size, hidden_size, w_itemsize, block_n, vmem_cap):
    """Largest 128-multiple divisor of Hp <= block_n whose double-buffered
    weight tiles fit in ~40% of VMEM (falls back to 128)."""
    budget = int(0.4 * vmem_cap)
    target = max(_round_up(block_n, _LANE), _LANE)
    best = _LANE
    for tn in range(_LANE, Hp + 1, _LANE):
        if Hp % tn:
            continue
        w_tiles = 2 * (input_size + hidden_size) * 4 * tn * w_itemsize
        if tn <= target and w_tiles <= budget:
            best = max(best, tn)
    return best


def prepare_lstm_params(w_x2h, b_x2h, w_h2h, b_h2h, *,
                        param_dtype=jnp.float32, block_n=512):
    """One-time parameter preparation (fuse, transpose, pad, cast).

    w_x2h: (4H, I), w_h2h: (4H, H), biases: (4H,) -- PyTorch Linear layout,
    gate order [i, f, g, o] along the 4H axis (matches gates.chunk(4, 1)).
    Returns (Wx, Wh, b, meta):
      Wx: (I, 4*Hp), Wh: (H, 4*Hp), b: (1, 4*Hp)  -- gate-blocked columns.
    `meta` holds static Python ints; do not pass it as a traced jit argument.
    """
    four_h, input_size = w_x2h.shape
    hidden_size = w_h2h.shape[1]
    assert four_h == 4 * hidden_size

    Hp = _round_up(hidden_size, _LANE)
    w_itemsize = jnp.dtype(param_dtype).itemsize
    TN = _choose_tn(Hp, input_size, hidden_size, w_itemsize, block_n,
                    _vmem_capacity_bytes())
    nn = Hp // TN

    wx = _gate_blocked_weight(w_x2h, hidden_size, Hp, TN, param_dtype)
    wh = _gate_blocked_weight(w_h2h, hidden_size, Hp, TN, param_dtype)

    bsum = jnp.zeros((4 * hidden_size,), jnp.float32)
    if b_x2h is not None:
        bsum = bsum + b_x2h.astype(jnp.float32)
    if b_h2h is not None:
        bsum = bsum + b_h2h.astype(jnp.float32)
    bp = jnp.zeros((4, Hp), jnp.float32).at[:, :hidden_size].set(
        bsum.reshape(4, hidden_size))
    bp = bp.reshape(4, nn, TN).transpose(1, 0, 2).reshape(1, nn * 4 * TN)

    meta = dict(input_size=input_size, hidden_size=hidden_size,
                Hp=Hp, TN=TN, nn=nn)
    return wx, wh, bp, meta


def lstm_cell_pallas(x, hidden, params, *, block_b=256):
    """Forward pass matching LSTMCell.forward(x, (hx, cx)) -> (hy, cy)."""
    w_x, w_h, b_p, meta = params
    hx, cx = hidden
    I, H = meta["input_size"], meta["hidden_size"]
    Hp, TN, nn = meta["Hp"], meta["TN"], meta["nn"]

    x2 = x.reshape(-1, x.shape[-1])                 # == x.view(-1, x.size(-1))
    hx2 = hx.reshape(-1, H)
    cx2 = cx.reshape(-1, H)
    B = x2.shape[0]
    hy_dtype, cy_dtype = hx.dtype, cx.dtype         # preserve cell-state dtype

    # Padding-aware batch tiling: minimal row padding, TB a multiple of 8.
    sub = _SUB if jnp.dtype(x2.dtype).itemsize >= 4 else 2 * _SUB
    TBmax = max(_round_up(block_b, sub), sub)
    Bp0 = _round_up(B, sub)
    n_bt = -(-Bp0 // TBmax)
    TB = _round_up(-(-Bp0 // n_bt), sub)
    Bp = TB * n_bt

    def pad_rows(a):
        return a if a.shape[0] == Bp else jnp.pad(a, ((0, Bp - a.shape[0]),
                                                      (0, 0)))

    x_p = pad_rows(x2)                               # native dtype, K dim unpadded
    hx_p = pad_rows(hx2)
    cx_p = cx2 if Hp == H else jnp.pad(cx2, ((0, 0), (0, Hp - H)))
    cx_p = pad_rows(cx_p)                            # native dtype

    grid = (nn, n_bt)   # gate-H outer, batch inner -> weight tile VMEM-resident

    in_specs = [
        pl.BlockSpec((TB, I), lambda j, i: (i, 0)),          # x
        pl.BlockSpec((TB, H), lambda j, i: (i, 0)),          # hx
        pl.BlockSpec((TB, TN), lambda j, i: (i, j)),         # cx
        pl.BlockSpec((I, 4 * TN), lambda j, i: (0, j)),      # Wx (gate-blocked)
        pl.BlockSpec((H, 4 * TN), lambda j, i: (0, j)),      # Wh (gate-blocked)
        pl.BlockSpec((1, 4 * TN), lambda j, i: (0, j)),      # bias
    ]
    out_specs = (pl.BlockSpec((TB, TN), lambda j, i: (i, j)),
                 pl.BlockSpec((TB, TN), lambda j, i: (i, j)))

    # VMEM budget from the chosen tiles (x2 for double-buffering) + headroom,
    # capped below the physical per-core VMEM (64 MiB on v7x).
    w_is = jnp.dtype(w_x.dtype).itemsize
    tile_bytes = (
        2 * TB * (I * x_p.dtype.itemsize + H * hx_p.dtype.itemsize)
        + 2 * TB * TN * cx_p.dtype.itemsize
        + 2 * (I + H) * 4 * TN * w_is
        + 2 * 4 * TN * 4
        + 2 * TB * TN * (jnp.dtype(hy_dtype).itemsize
                         + jnp.dtype(cy_dtype).itemsize))
    vmem_cap = _vmem_capacity_bytes()
    vmem_limit = int(min(max(tile_bytes + (8 << 20), 32 << 20),
                         int(0.9 * vmem_cap)))

    # Megacore: shard the gate-H axis when it exists (each core holds only its
    # weight tiles); otherwise shard the batch axis.
    dims = ("parallel", "arbitrary") if nn >= 2 else ("arbitrary", "parallel")

    hy, cy = pl.pallas_call(
        _lstm_cell_kernel,
        out_shape=(jax.ShapeDtypeStruct((Bp, Hp), hy_dtype),
                   jax.ShapeDtypeStruct((Bp, Hp), cy_dtype)),
        grid=grid,
        in_specs=in_specs,
        out_specs=out_specs,
        compiler_params=pltpu.CompilerParams(
            dimension_semantics=dims,
            vmem_limit_bytes=vmem_limit),
    )(x_p, hx_p, cx_p, w_x, w_h, b_p)

    return hy[:B, :H], cy[:B, :H]


def lstm_cell_ref(x, hx, cx, w_x2h, b_x2h, w_h2h, b_h2h):
    x = x.reshape(-1, x.shape[-1])
    gates = x @ w_x2h.T + b_x2h + hx @ w_h2h.T + b_h2h
    i, f, g, o = jnp.split(gates, 4, axis=1)
    i, f, o = jax.nn.sigmoid(i), jax.nn.sigmoid(f), jax.nn.sigmoid(o)
    g = jnp.tanh(g)
    cy = cx * f + i * g
    hy = o * jnp.tanh(cy)
    return hy, cy


if __name__ == "__main__":
    def make_inputs(key, B, I, H):
        kx, kh, kc, kw1, kb1, kw2, kb2 = jax.random.split(key, 7)
        std = 1.0 / jnp.sqrt(H)   # matches reset_parameters(): U(-std, std)
        x = jax.random.normal(kx, (B, I), jnp.float32)
        hx = jax.random.normal(kh, (B, H), jnp.float32)
        cx = jax.random.normal(kc, (B, H), jnp.float32)
        w_x2h = jax.random.uniform(kw1, (4 * H, I), minval=-std, maxval=std)
        b_x2h = jax.random.uniform(kb1, (4 * H,), minval=-std, maxval=std)
        w_h2h = jax.random.uniform(kw2, (4 * H, H), minval=-std, maxval=std)
        b_h2h = jax.random.uniform(kb2, (4 * H,), minval=-std, maxval=std)
        return x, hx, cx, w_x2h, b_x2h, w_h2h, b_h2h

    key = jax.random.PRNGKey(0)
    cases = [
        # (B,  I,   H,   param_dtype,  block_n, block_b, tol)
        (8,  32,  32,  jnp.float32,  512, 256, 1e-4),  # small shape, f32 path
        (5,  20,  48,  jnp.float32,  512, 256, 1e-4),  # ragged -> row/col padding
        (8,  64, 256,  jnp.bfloat16, 128, 256, 5e-2),  # bf16 weights, nn=2 grid
        (20, 16,  64,  jnp.float32,  512,   8, 1e-4),  # multiple batch tiles
    ]
    for idx, (B, I, H, pdt, bn, bb, tol) in enumerate(cases):
        key, sub = jax.random.split(key)
        x, hx, cx, w1, b1, w2, b2 = make_inputs(sub, B, I, H)
        params = prepare_lstm_params(w1, b1, w2, b2, param_dtype=pdt, block_n=bn)
        jax.block_until_ready((params[0], params[1], params[2]))
        hy, cy = lstm_cell_pallas(x, (hx, cx), params, block_b=bb)
        jax.block_until_ready((hy, cy))
        hy_r, cy_r = lstm_cell_ref(x, hx, cx, w1, b1, w2, b2)
        assert hy.shape == (B, H) and cy.shape == (B, H), f"case {idx} shape"
        assert jnp.allclose(hy, hy_r, atol=tol, rtol=tol), f"case {idx} hy mismatch"
        assert jnp.allclose(cy, cy_r, atol=tol, rtol=tol), f"case {idx} cy mismatch"

    print("KERNEL_OK")
</pallas_src>

<mosaic_0001>
module attributes {stable_mosaic.version = 11 : i64} {
  func.func @_lstm_cell_kernel(%arg0: i32, %arg1: i32, %arg2: memref<8x32xf32, #tpu.memory_space<vmem>>, %arg3: memref<8x32xf32, #tpu.memory_space<vmem>>, %arg4: memref<8x128xf32, #tpu.memory_space<vmem>>, %arg5: memref<32x512xf32, #tpu.memory_space<vmem>>, %arg6: memref<32x512xf32, #tpu.memory_space<vmem>>, %arg7: memref<1x512xf32, #tpu.memory_space<vmem>>, %arg8: memref<8x128xf32, #tpu.memory_space<vmem>>, %arg9: memref<8x128xf32, #tpu.memory_space<vmem>>) attributes {dimension_semantics = [#tpu.dimension_semantics<arbitrary>, #tpu.dimension_semantics<parallel>], iteration_bounds = array<i64: 1, 1>, scalar_prefetch = 0 : i64, scratch_operands = 0 : i64, tpu.core_type = #tpu.core_type<tc>, window_params = [{transform_indices = @transform_0, window_bounds = array<i64: 8, 32>}, {transform_indices = @transform_1, window_bounds = array<i64: 8, 32>}, {transform_indices = @transform_2, window_bounds = array<i64: 8, 128>}, {transform_indices = @transform_3, window_bounds = array<i64: 32, 512>}, {transform_indices = @transform_4, window_bounds = array<i64: 32, 512>}, {transform_indices = @transform_5, window_bounds = array<i64: 1, 512>}, {transform_indices = @transform_6, window_bounds = array<i64: 8, 128>}, {transform_indices = @transform_7, window_bounds = array<i64: 8, 128>}]} {
    %c0 = arith.constant 0 : index
    %c0_0 = arith.constant 0 : index
    %0 = vector.load %arg2[%c0, %c0_0] : memref<8x32xf32, #tpu.memory_space<vmem>>, vector<8x32xf32>
    %c0_1 = arith.constant 0 : index
    %c0_2 = arith.constant 0 : index
    %1 = vector.load %arg5[%c0_1, %c0_2] : memref<32x512xf32, #tpu.memory_space<vmem>>, vector<32x512xf32>
    %cst = arith.constant dense<0.000000e+00> : vector<8x512xf32>
    %2 = tpu.matmul %0, %1, %cst {dimension_numbers = #tpu.dot_dimension_numbers<[1], [0], [0], [1], [0, 0, 1, 1], [], []>} : vector<8x32xf32>, vector<32x512xf32>, vector<8x512xf32> -> vector<8x512xf32>
    %c0_3 = arith.constant 0 : index
    %c0_4 = arith.constant 0 : index
    %3 = vector.load %arg3[%c0_3, %c0_4] : memref<8x32xf32, #tpu.memory_space<vmem>>, vector<8x32xf32>
    %c0_5 = arith.constant 0 : index
    %c0_6 = arith.constant 0 : index
    %4 = vector.load %arg6[%c0_5, %c0_6] : memref<32x512xf32, #tpu.memory_space<vmem>>, vector<32x512xf32>
    %cst_7 = arith.constant dense<0.000000e+00> : vector<8x512xf32>
    %5 = tpu.matmul %3, %4, %cst_7 {dimension_numbers = #tpu.dot_dimension_numbers<[1], [0], [0], [1], [0, 0, 1, 1], [], []>} : vector<8x32xf32>, vector<32x512xf32>, vector<8x512xf32> -> vector<8x512xf32>
    %6 = arith.addf %2, %5 : vector<8x512xf32>
    %c0_8 = arith.constant 0 : index
    %c0_9 = arith.constant 0 : index
    %7 = vector.load %arg7[%c0_8, %c0_9] : memref<1x512xf32, #tpu.memory_space<vmem>>, vector<1x512xf32>
    %8 = vector.broadcast %7 : vector<1x512xf32> to vector<8x512xf32>
    %9 = arith.addf %6, %8 : vector<8x512xf32>
    %10 = vector.extract_strided_slice %9 {offsets = [0, 0], sizes = [8, 128], strides = [1, 1]} : vector<8x512xf32> to vector<8x128xf32>
    %cst_10 = arith.constant 5.000000e-01 : f32
    %11 = vector.broadcast %cst_10 : f32 to vector<8x128xf32>
    %12 = arith.mulf %11, %10 : vector<8x128xf32>
    %13 = math.tanh %12 : vector<8x128xf32>
    %cst_11 = arith.constant 5.000000e-01 : f32
    %14 = vector.broadcast %cst_11 : f32 to vector<8x128xf32>
    %15 = arith.mulf %14, %13 : vector<8x128xf32>
    %cst_12 = arith.constant 5.000000e-01 : f32
    %16 = vector.broadcast %cst_12 : f32 to vector<8x128xf32>
    %17 = arith.addf %15, %16 : vector<8x128xf32>
    %18 = vector.extract_strided_slice %9 {offsets = [0, 128], sizes = [8, 128], strides = [1, 1]} : vector<8x512xf32> to vector<8x128xf32>
    %cst_13 = arith.constant 5.000000e-01 : f32
    %19 = vector.broadcast %cst_13 : f32 to vector<8x128xf32>
    %20 = arith.mulf %19, %18 : vector<8x128xf32>
    %21 = math.tanh %20 : vector<8x128xf32>
    %cst_14 = arith.constant 5.000000e-01 : f32
    %22 = vector.broadcast %cst_14 : f32 to vector<8x128xf32>
    %23 = arith.mulf %22, %21 : vector<8x128xf32>
    %cst_15 = arith.constant 5.000000e-01 : f32
    %24 = vector.broadcast %cst_15 : f32 to vector<8x128xf32>
    %25 = arith.addf %23, %24 : vector<8x128xf32>
    %26 = vector.extract_strided_slice %9 {offsets = [0, 256], sizes = [8, 128], strides = [1, 1]} : vector<8x512xf32> to vector<8x128xf32>
    %27 = math.tanh %26 : vector<8x128xf32>
    %28 = vector.extract_strided_slice %9 {offsets = [0, 384], sizes = [8, 128], strides = [1, 1]} : vector<8x512xf32> to vector<8x128xf32>
    %cst_16 = arith.constant 5.000000e-01 : f32
    %29 = vector.broadcast %cst_16 : f32 to vector<8x128xf32>
    %30 = arith.mulf %29, %28 : vector<8x128xf32>
    %31 = math.tanh %30 : vector<8x128xf32>
    %cst_17 = arith.constant 5.000000e-01 : f32
    %32 = vector.broadcast %cst_17 : f32 to vector<8x128xf32>
    %33 = arith.mulf %32, %31 : vector<8x128xf32>
    %cst_18 = arith.constant 5.000000e-01 : f32
    %34 = vector.broadcast %cst_18 : f32 to vector<8x128xf32>
    %35 = arith.addf %33, %34 : vector<8x128xf32>
    %c0_19 = arith.constant 0 : index
    %c0_20 = arith.constant 0 : index
    %36 = vector.load %arg4[%c0_19, %c0_20] : memref<8x128xf32, #tpu.memory_space<vmem>>, vector<8x128xf32>
    %37 = arith.mulf %25, %36 : vector<8x128xf32>
    %38 = arith.mulf %17, %27 : vector<8x128xf32>
    %39 = arith.addf %37, %38 : vector<8x128xf32>
    %40 = math.tanh %39 : vector<8x128xf32>
    %41 = arith.mulf %35, %40 : vector<8x128xf32>
    %c0_21 = arith.constant 0 : index
    %c0_22 = arith.constant 0 : index
    %42 = vector.load %arg9[%c0_21, %c0_22] : memref<8x128xf32, #tpu.memory_space<vmem>>, vector<8x128xf32>
    tpu.vector_store %arg9[%c0_21, %c0_22], %39 {strides = array<i32>} : memref<8x128xf32, #tpu.memory_space<vmem>>, vector<8x128xf32>,
    %c0_23 = arith.constant 0 : index
    %c0_24 = arith.constant 0 : index
    %43 = vector.load %arg8[%c0_23, %c0_24] : memref<8x128xf32, #tpu.memory_space<vmem>>, vector<8x128xf32>
    tpu.vector_store %arg8[%c0_23, %c0_24], %41 {strides = array<i32>} : memref<8x128xf32, #tpu.memory_space<vmem>>, vector<8x128xf32>,
    return
  }
  func.func @transform_0(%arg0: i32, %arg1: i32) -> (i32, i32) {
    %c0_i32 = arith.constant 0 : i32
    %c0_i32_0 = arith.constant 0 : i32
    return %arg1, %c0_i32 : i32, i32
  }
  func.func @transform_1(%arg0: i32, %arg1: i32) -> (i32, i32) {
    %c0_i32 = arith.constant 0 : i32
    %c0_i32_0 = arith.constant 0 : i32
    return %arg1, %c0_i32 : i32, i32
  }
  func.func @transform_2(%arg0: i32, %arg1: i32) -> (i32, i32) {
    %c0_i32 = arith.constant 0 : i32
    return %arg1, %arg0 : i32, i32
  }
  func.func @transform_3(%arg0: i32, %arg1: i32) -> (i32, i32) {
    %c0_i32 = arith.constant 0 : i32
    %c0_i32_0 = arith.constant 0 : i32
    return %c0_i32, %arg0 : i32, i32
  }
  func.func @transform_4(%arg0: i32, %arg1: i32) -> (i32, i32) {
    %c0_i32 = arith.constant 0 : i32
    %c0_i32_0 = arith.constant 0 : i32
    return %c0_i32, %arg0 : i32, i32
  }
  func.func @transform_5(%arg0: i32, %arg1: i32) -> (i32, i32) {
    %c0_i32 = arith.constant 0 : i32
    %c0_i32_0 = arith.constant 0 : i32
    return %c0_i32, %arg0 : i32, i32
  }
  func.func @transform_6(%arg0: i32, %arg1: i32) -> (i32, i32) {
    %c0_i32 = arith.constant 0 : i32
    return %arg1, %arg0 : i32, i32
  }
  func.func @transform_7(%arg0: i32, %arg1: i32) -> (i32, i32) {
    %c0_i32 = arith.constant 0 : i32
    return %arg1, %arg0 : i32, i32
  }
}

</mosaic_0001>

<bundles_post_ra>
// kernel: tpu_custom_call.1
= control target key start
LH: loop header
LB: loop body
LE: loop exit
PB: predicated region body
PF: predicated region fallthrough
CT: control target
= control target key end

     0   :  { %13 = vsyncpa [#allocation3], 0  ;;  %s656_s0 = inlined_call_operand.hbm [shape: f32[8,32], index: 0, kind: input, shape index: {}]   ;;  %s657_s1 = inlined_call_operand.hbm [shape: f32[8,32], index: 1, kind: input, shape index: {}]   ;;  %s658_s2 = inlined_call_operand.hbm [shape: f32[8,128], index: 2, kind: input, shape index: {}]   ;;  %s659_s3 = inlined_call_operand.hbm [shape: f32[32,512], index: 3, kind: input, shape index: {}]   ;;  %s660_s4 = inlined_call_operand.hbm [shape: f32[32,512], index: 4, kind: input, shape index: {}]   ;;  %s661_s5 = inlined_call_operand.vmem [shape: f32[1,512], index: 5, kind: input, shape index: {}]   ;;  %s662_s6 = inlined_call_operand.hbm [shape: f32[8,128], index: 6, kind: output, shape index: {0}]   ;;  %s663_s7 = inlined_call_operand.hbm [shape: f32[8,128], index: 7, kind: output, shape index: {1}]  }
   0x1   :  { %14 = vsyncpa [#allocation6], 0 }
   0x2   :  { %15 = vsyncpa [#allocation9], 0 }
   0x3   :  { %16 = vsyncpa [#allocation4], 0  ;;  %s34_s26 = sshll.u32 %s657_s1, 4  ;;  %s35_s26 = int_to_ptr.hbm [resolvable:$true] %s34_s26 }
   0x4   :  { %17 = vsyncpa [#allocation13], 0  ;;  %s575_s27 = smov [#allocation5]   ;;  %s55_s8 = sshll.u32 %s659_s3, 4  ;;  %s56_s8 = int_to_ptr.hbm [resolvable:$true] %s55_s8 }
   0x5   :  { %s36_s28 = sshll.u32 %s575_s27, 4  ;;  %s576_s9 = smov [#allocation8]   ;;  %s37_s28 = int_to_ptr.vmem [resolvable:$true] %s36_s28 }
   0x6   :  { %39 = dma.hbm_to_vmem [thread:$0]  %s35_s26, 128, %s37_s28, [#allocation6]  }
   0x7   :  { %s57_s10 = sshll.u32 %s576_s9, 4  ;;  %s577_s11 = smov 512   ;;  %s58_s10 = int_to_ptr.vmem [resolvable:$true] %s57_s10 }
   0x8   :  { %s578_s12 = smov 32   ;;  %s23_s1 = sshll.u32 %s656_s0, 4  ;;  %s24_s1 = int_to_ptr.hbm [resolvable:$true] %s23_s1 }
   0x9   :  { %63 = dma.hbm_to_vmem [thread:$0]  %s56_s8, 2048, %s58_s10, [#allocation9], %s577_s11, %s577_s11, %s578_s12  }
   0xa   :  { %s579_s15 = smov [#allocation2]   ;;  %s45_s3 = sshll.u32 %s658_s2, 4  ;;  %s46_s3 = int_to_ptr.hbm [resolvable:$true] %s45_s3 }
   0xb   :  { %s25_s16 = sshll.u32 %s579_s15, 4  ;;  %s580_s19 = smov [#allocation7]   ;;  %s26_s16 = int_to_ptr.vmem [resolvable:$true] %s25_s16 }
   0xc   :  { %28 = dma.hbm_to_vmem [thread:$0]  %s24_s1, 128, %s26_s16, [#allocation3]  }
   0xd   :  { %s47_s20 = sshll.u32 %s580_s19, 4  ;;  %s68_s23 = sshll.u32 %s660_s4, 4  ;;  %s48_s20 = int_to_ptr.vmem [resolvable:$true] %s47_s20  ;;  %s69_s23 = int_to_ptr.hbm [resolvable:$true] %s68_s23 }
   0xe   :  { %50 = dma.hbm_to_vmem [thread:$0]  %s46_s3, 128, %s48_s20, [#allocation6]  }
   0xf   :  { %s581_s0 = smov [#allocation10]  }
  0x10   :  { %s70_s24 = sshll.u32 %s581_s0, 4  ;;  %s71_s24 = int_to_ptr.vmem [resolvable:$true] %s70_s24 }
  0x11   :  { %76 = dma.hbm_to_vmem [thread:$0]  %s69_s23, 2048, %s71_s24, [#allocation9], %s577_s11, %s577_s11, %s578_s12  }
  0x12   :  { %565 = dma.done.wait [#allocation3], 128  }
  0x13   :  { %566 = vsyncadd [#allocation3], 4294967168 }
  0x14   :  { %567 = dma.done.wait [#allocation6], 256  }
  0x15   :  { %568 = vsyncadd [#allocation6], 4294967040 }
  0x16   :  { %569 = dma.done.wait [#allocation9], 4096  }
  0x17   :  { %570 = vsyncadd [#allocation9], 4294963200  ;;  %v129_v0 = vld [vmem:[#allocation10 + $0x60] sm:$0xff]  ;;  %v130_v1 = vld [vmem:[#allocation10 + $0x68] sm:$0xff]  ;;  %vm133_vm0 = vcmask 261120   ;;  %s353_s28 = sshll.u32 %s663_s7, 4  ;;  %s354_s28 = int_to_ptr.hbm [resolvable:$true] %s353_s28 }
  0x18   :  { %v131_v2 = vld [vmem:[#allocation10 + $0x70] sm:$0xff]  ;;  %149 = vmatpush.msra.mxu0 %v129_v0  ;;  %169 = vmatpush.msra.mxu1 %v130_v1  ;;  %v132_v3 = vld [vmem:[#allocation10 + $0x78] sm:$0xff]  ;;  %v125_v4 = vld [vmem:[#allocation10 + $0x40] sm:$0xff]  ;;  %s583_s29 = smov [#allocation11]   ;;  %s342_s10 = sshll.u32 %s662_s6, 4  ;;  %s343_s10 = int_to_ptr.hbm [resolvable:$true] %s342_s10 }
  0x19   :  { %v126_v5 = vld [vmem:[#allocation10 + $0x48] sm:$0xff]  ;;  %189 = vmatpush.msra.mxu2 %v131_v2  ;;  %209 = vmatpush.msra.mxu3 %v132_v3  ;;  %v127_v6 = vld [vmem:[#allocation10 + $0x50] sm:$0xff]  ;;  %v128_v7 = vld [vmem:[#allocation10 + $0x58] sm:$0xff]  ;;  %s340_s30 = sshll.u32 %s583_s29, 4  ;;  %s341_s30 = int_to_ptr.vmem [resolvable:$true] %s340_s30 }
  0x1a   :  { %v121_v8 = vld [vmem:[#allocation10 + $0x20] sm:$0xff]  ;;  %150 = vmatpush.msra.mxu0 %v125_v4  ;;  %170 = vmatpush.msra.mxu1 %v126_v5  ;;  %v122_v9 = vld [vmem:[#allocation10 + $0x28] sm:$0xff]  ;;  %v123_v10 = vld [vmem:[#allocation10 + $0x30] sm:$0xff] }
  0x1b   :  { %v124_v11 = vld [vmem:[#allocation10 + $0x38] sm:$0xff]  ;;  %190 = vmatpush.msra.mxu2 %v127_v6  ;;  %210 = vmatpush.msra.mxu3 %v128_v7  ;;  %v117_v12 = vld [vmem:[#allocation10] sm:$0xff]  ;;  %v118_v13 = vld [vmem:[#allocation10 + $0x8] sm:$0xff] }
  0x1c   :  { %151 = vmatpush.msra.mxu0 %v121_v8  ;;  %171 = vmatpush.msra.mxu1 %v122_v9  ;;  %v119_v14 = vld [vmem:[#allocation10 + $0x10] sm:$0xff]  ;;  %v120_v15 = vld [vmem:[#allocation10 + $0x18] sm:$0xff]  ;;  %v112_v17 = vld [vmem:[#allocation8 + $0x60] sm:$0xff] }
  0x1d   :  { %191 = vmatpush.msra.mxu2 %v123_v10  ;;  %211 = vmatpush.msra.mxu3 %v124_v11  ;;  %v116_v16 = vld [vmem:[#allocation5] sm:$0xff]  ;;  %v113_v18 = vld [vmem:[#allocation8 + $0x68] sm:$0xff]  ;;  %v115_v20 = vld [vmem:[#allocation8 + $0x78] sm:$0xff] }
  0x1e   :  { %152 = vmatpush.msra.mxu0 %v117_v12  ;;  %172 = vmatpush.msra.mxu1 %v118_v13  ;;  %v114_v19 = vld [vmem:[#allocation8 + $0x70] sm:$0xff]  ;;  %v108_v21 = vld [vmem:[#allocation8 + $0x40] sm:$0xff]  ;;  %v109_v22 = vld [vmem:[#allocation8 + $0x48] sm:$0xff] }
  0x1f   :  { %192 = vmatpush.msra.mxu2 %v119_v14  ;;  %212 = vmatpush.msra.mxu3 %v120_v15  ;;  %v110_v23 = vld [vmem:[#allocation8 + $0x50] sm:$0xff]  ;;  %v111_v24 = vld [vmem:[#allocation8 + $0x58] sm:$0xff]  ;;  %v104_v25 = vld [vmem:[#allocation8 + $0x20] sm:$0xff] }
  0x20   :  { %370 = vmatmul.msk.f32.vlgmr.msra.gmra.mxu0 %vm133_vm0, %v116_v16  ;;  %371 = vmatmul.msk.f32.vlgmr.msra.gmra.mxu1 %vm133_vm0, %v116_v16  ;;  %v105_v26 = vld [vmem:[#allocation8 + $0x28] sm:$0xff]  ;;  %v106_v27 = vld [vmem:[#allocation8 + $0x30] sm:$0xff]  ;;  %v107_v28 = vld [vmem:[#allocation8 + $0x38] sm:$0xff] }
  0x21   :  { %372 = vmatmul.msk.f32.vlgmr.msra.gmra.mxu2 %vm133_vm0, %v116_v16  ;;  %373 = vmatmul.msk.f32.vlgmr.msra.gmra.mxu3 %vm133_vm0, %v116_v16  ;;  %v100_v29 = vld [vmem:[#allocation8] sm:$0xff]  ;;  %v101_v30 = vld [vmem:[#allocation8 + $0x8] sm:$0xff]  ;;  %v102_v31 = vld [vmem:[#allocation8 + $0x10] sm:$0xff] }
  0x22   :  { %232 = vmatpush.msrb.mxu0 %v112_v17  ;;  %252 = vmatpush.msrb.mxu1 %v113_v18  ;;  %v103_v32 = vld [vmem:[#allocation8 + $0x18] sm:$0xff]  ;;  %v99_v33 = vld [vmem:[#allocation2] sm:$0xff] }
  0x23   :  { %272 = vmatpush.msrb.mxu2 %v114_v19  ;;  %292 = vmatpush.msrb.mxu3 %v115_v20  ;;  %v300_v36 = vld [vmem:[%s661_s5] sm:$0xf]  ;;  %v327_v63 = vld [vmem:[#allocation7] sm:$0xff]  ;;  %s582_s5 = smov [#allocation12]  }
  0x24   :  { %233 = vmatpush.msrb.mxu0 %v108_v21  ;;  %253 = vmatpush.msrb.mxu1 %v109_v22  ;;  %v302_v39 = vperm.slane %v300_v36, 0  ;;  %v303_v40 = vperm.slane %v300_v36, 1  ;;  %v304_v49 = vperm.slane %v300_v36, 2  ;;  %v305_v50 = vperm.slane %v300_v36, 3  ;;  %s351_s25 = sshll.u32 %s582_s5, 4  ;;  %s352_s25 = int_to_ptr.vmem [resolvable:$true] %s351_s25 }
  0x25   :  { %273 = vmatpush.msrb.mxu2 %v110_v23  ;;  %293 = vmatpush.msrb.mxu3 %v111_v24 }
  0x26   :  { %234 = vmatpush.msrb.mxu0 %v104_v25  ;;  %254 = vmatpush.msrb.mxu1 %v105_v26 }
  0x27   :  { %274 = vmatpush.msrb.mxu2 %v106_v27  ;;  %294 = vmatpush.msrb.mxu3 %v107_v28 }
  0x28   :  { %235 = vmatpush.msrb.mxu0 %v100_v29  ;;  %255 = vmatpush.msrb.mxu1 %v101_v30 }
  0x29   :  { %275 = vmatpush.msrb.mxu2 %v102_v31  ;;  %295 = vmatpush.msrb.mxu3 %v103_v32 }
  0x2a   :  { %374 = vmatmul.msk.f32.vlgmr.msrb.gmra.mxu0 %vm133_vm0, %v99_v33  ;;  %375 = vmatmul.msk.f32.vlgmr.msrb.gmra.mxu1 %vm133_vm0, %v99_v33 }
  0x2b   :  { %376 = vmatmul.msk.f32.vlgmr.msrb.gmra.mxu2 %vm133_vm0, %v99_v33  ;;  %377 = vmatmul.msk.f32.vlgmr.msrb.gmra.mxu3 %vm133_vm0, %v99_v33 }
  0x9d   :  { %v154_v34 = vpop.f32.mrf.mxu0  ;;  %v174_v35 = vpop.f32.mrf.mxu1 }
  0xa4   :  { %v194_v37 = vpop.f32.mrf.mxu2  ;;  %v214_v38 = vpop.f32.mrf.mxu3 }
  0xa7   :  { %v237_v41 = vpop.f32.mrf.mxu0  ;;  %v257_v42 = vpop.f32.mrf.mxu1 }
  0xa8   :  { %v238_v43 = vadd.f32 %v237_v41, %v154_v34  ;;  %v258_v44 = vadd.f32 %v257_v42, %v174_v35 }
  0xaa   :  { %v310_v45 = vadd.f32 %v302_v39, %v238_v43  ;;  %v311_v46 = vadd.f32 %v303_v40, %v258_v44 }
  0xac   :  { %v314_v47 = vmul.f32 0.5, %v310_v45  ;;  %v318_v48 = vmul.f32 0.5, %v311_v46 }
  0xae   :  { %387 = vtanh.f32 %v314_v47  ;;  %v277_v51 = vpop.f32.mrf.mxu2  ;;  %v297_v52 = vpop.f32.mrf.mxu3 }
  0xaf   :  { %389 = vtanh.f32 %v318_v48  ;;  %v278_v53 = vadd.f32 %v277_v51, %v194_v37  ;;  %v298_v54 = vadd.f32 %v297_v52, %v214_v38 }
  0xb1   :  { %v312_v55 = vadd.f32 %v304_v49, %v278_v53  ;;  %v313_v56 = vadd.f32 %v305_v50, %v298_v54 }
  0xb3   :  { %391 = vtanh.f32 %v312_v55  ;;  %v323_v57 = vmul.f32 0.5, %v313_v56 }
  0xb4   :  { %v388_v58 = vpop.eup %387 }
  0xb5   :  { %v390_v59 = vpop.eup %389  ;;  %v316_v60 = vmul.f32 0.5, %v388_v58  ;;  %393 = vtanh.f32 %v323_v57 }
  0xb6   :  { %v320_v61 = vmul.f32 0.5, %v390_v59 }
  0xb7   :  { %v317_v62 = vadd.f32 0.5, %v316_v60 }
  0xb8   :  { %v321_v0 = vadd.f32 0.5, %v320_v61 }
  0xb9   :  { %v392_v1 = vpop.eup %391 }
  0xba   :  { %v328_v2 = vmul.f32 %v327_v63, %v321_v0  ;;  %v329_v3 = vmul.f32 %v392_v1, %v317_v62 }
  0xbb   :  { %v394_v4 = vpop.eup %393 }
  0xbc   :  { %v330_v5 = vadd.f32 %v329_v3, %v328_v2  ;;  %v325_v6 = vmul.f32 0.5, %v394_v4 }
  0xbe   :  { %333 = vst [vmem:[#allocation12] sm:$0xff] %v330_v5  ;;  %395 = vtanh.f32 %v330_v5  ;;  %v326_v7 = vadd.f32 0.5, %v325_v6 }
  0xbf   :  { %356 = dma.vmem_to_hbm [thread:$0]  %s352_s25, 128, %s354_s28, [#allocation13]  }
  0xc4   :  { %v396_v8 = vpop.eup %395 }
  0xc5   :  { %v332_v9 = vmul.f32 %v396_v8, %v326_v7 }
  0xc7   :  { %334 = vst [vmem:[#allocation11] sm:$0xff] %v332_v9 }
  0xc8   :  { %345 = dma.vmem_to_hbm [thread:$0]  %s341_s30, 128, %s343_s10, [#allocation4]  }
  0xc9   :  { %571 = dma.done.wait [#allocation4], 128  }
  0xca   :  { %572 = vsyncadd [#allocation4], 4294967168 }
  0xcb   :  { %573 = dma.done.wait [#allocation13], 128  }
  0xcc   :  { %574 = vsyncadd [#allocation13], 4294967168 }
  0xcd   :  { %365 = vsyncpa [#allocation3], 1 }
  0xce   :  { %366 = vsyncpa [#allocation6], 1 }
  0xcf   :  { %367 = vsyncpa [#allocation9], 1 }
  0xd0   :  { %368 = vsyncpa [#allocation4], 1 }
  0xd1   :  { %369 = vsyncpa [#allocation13], 1 }

</bundles_post_ra>
